<compile_context>
chip_gen: v6e
topology: v6e:2x2x1
jax: 0.10.0
libtpu: 0.0.40
codegen_flags: <defaults>
</compile_context>

<pallas_src>
import jax
import jax.numpy as jnp
import numpy as np
from jax.experimental import pallas as pl
from jax.experimental.pallas import tpu as pltpu

LANE = 128


def _std_upsample_kernel(x_ref, w_ref, b_ref, scale_ref, shift_ref, o_ref):
    # x_ref: (TB, Cin) bf16   w_ref: (Cin, Npad) bf16 (VMEM-resident)
    # b/scale/shift: (1, Npad) f32 per-output-column vectors
    y = jnp.dot(x_ref[...], w_ref[...], preferred_element_type=jnp.float32)
    y = y + b_ref[...]                        # ConvTranspose2d bias
    y = jnp.maximum(y, 0.0)                   # ReLU
    y = y * scale_ref[...] + shift_ref[...]   # folded BatchNorm (eval mode)
    o_ref[...] = y.astype(o_ref.dtype)


def std_upsample(x, params, *, kern, stri, pad=0, eps=1e-5, row_tile=256):
    """x: (N, Cin, H, W) f32.  params['w']: (Cin, Cout, K, K) torch ConvT layout,
    params['b'], 'gamma', 'beta', 'mean', 'var': (Cout,)."""
    if kern != stri or pad != 0:
        # TODO(synk): general overlapping ConvTranspose2d (stride != kern or pad != 0).
        raise NotImplementedError("only the non-overlapping kern == stri, pad == 0 case")
    # TODO(synk): BatchNorm2d training-mode batch statistics; eval-mode running stats are used.
    # TODO(synk): training-mode Dropout not implemented (identity at inference).

    N, Cin, H, W = x.shape
    w = params["w"]
    K = kern
    Cout = w.shape[1]
    ncols = Cout * K * K
    ncols_pad = ((ncols + LANE - 1) // LANE) * LANE    # lane-dense output columns

    # pixels -> rows (sublanes), channels -> lanes; bf16 operands for the MXU.
    x2d = x.transpose(0, 2, 3, 1).reshape(N * H * W, Cin).astype(jnp.bfloat16)
    w2d = w.reshape(Cin, ncols).astype(jnp.bfloat16)
    w2d = jnp.pad(w2d, ((0, 0), (0, ncols_pad - ncols)))

    def per_column(v):  # per-output-channel (Cout,) -> per-column (1, ncols_pad) f32
        v = jnp.repeat(v.astype(jnp.float32), K * K)
        return jnp.pad(v, (0, ncols_pad - ncols))[None, :]

    bias_c = per_column(params["b"])
    scale = params["gamma"] / jnp.sqrt(params["var"] + eps)
    shift = params["beta"] - params["mean"] * scale
    scale_c = per_column(scale)
    shift_c = per_column(shift)

    m = N * H * W
    tb = min(row_tile, m)
    m_pad = ((m + tb - 1) // tb) * tb
    if m_pad != m:
        x2d = jnp.pad(x2d, ((0, m_pad - m), (0, 0)))

    grid = (m_pad // tb,)
    cost = pl.CostEstimate(
        flops=2 * m_pad * Cin * ncols_pad + 3 * m_pad * ncols_pad,
        transcendentals=0,
        bytes_accessed=(x2d.size * 2 + w2d.size * 2
                        + 3 * ncols_pad * 4 + m_pad * ncols_pad * 4),
    )

    y2d = pl.pallas_call(
        _std_upsample_kernel,
        out_shape=jax.ShapeDtypeStruct((m_pad, ncols_pad), jnp.float32),
        grid=grid,
        in_specs=[
            pl.BlockSpec((tb, Cin), lambda i: (i, 0)),          # x tile, pipelined
            pl.BlockSpec((Cin, ncols_pad), lambda i: (0, 0)),   # weights, resident
            pl.BlockSpec((1, ncols_pad), lambda i: (0, 0)),     # bias
            pl.BlockSpec((1, ncols_pad), lambda i: (0, 0)),     # BN scale
            pl.BlockSpec((1, ncols_pad), lambda i: (0, 0)),     # BN shift
        ],
        out_specs=pl.BlockSpec((tb, ncols_pad), lambda i: (i, 0)),
        compiler_params=pltpu.CompilerParams(
            dimension_semantics=("parallel",)),
        cost_estimate=cost,
    )(x2d, w2d, bias_c, scale_c, shift_c)

    # pixel -> KxK patch scatter (pure layout, done outside the kernel)
    y2d = y2d[:m, :ncols]
    y = y2d.reshape(N, H, W, Cout, K, K).transpose(0, 3, 1, 4, 2, 5)
    return y.reshape(N, Cout, H * K, W * K)


def _reference(x, params, *, kern, stri, eps=1e-5):
    """Pure-JAX reference mirroring the PyTorch forward (same bf16 operand cast)."""
    N, Cin, H, W = x.shape
    K = kern
    w = params["w"]
    Cout = w.shape[1]
    x2d = x.transpose(0, 2, 3, 1).reshape(-1, Cin).astype(jnp.bfloat16)
    w2d = w.reshape(Cin, Cout * K * K).astype(jnp.bfloat16)
    y = jnp.dot(x2d, w2d, preferred_element_type=jnp.float32)
    y = y + jnp.repeat(params["b"].astype(jnp.float32), K * K)[None, :]
    y = jnp.maximum(y, 0.0)
    scale = params["gamma"] / jnp.sqrt(params["var"] + eps)
    shift = params["beta"] - params["mean"] * scale
    y = y * jnp.repeat(scale, K * K)[None, :] + jnp.repeat(shift, K * K)[None, :]
    y = y.reshape(N, H, W, Cout, K, K).transpose(0, 3, 1, 4, 2, 5)
    return y.reshape(N, Cout, H * K, W * K)


if __name__ == "__main__":
    N, NIN, NOUT, H, W = 2, 4, 8, 16, 16
    KERN = STRI = 2

    key = jax.random.PRNGKey(0)
    key, kx, kw, kb, kg, kbe, km, kv = jax.random.split(key, 8)
    x = jax.random.normal(kx, (N, NIN, H, W), jnp.float32)

    bound = 1.0 / np.sqrt(NIN * KERN * KERN)
    params = {
        "w": jax.random.uniform(kw, (NIN, NOUT, KERN, KERN), jnp.float32, -bound, bound),
        "b": jax.random.uniform(kb, (NOUT,), jnp.float32, -bound, bound),
        "gamma": 1.0 + 0.1 * jax.random.normal(kg, (NOUT,), jnp.float32),
        "beta": 0.1 * jax.random.normal(kbe, (NOUT,), jnp.float32),
        "mean": 0.1 * jax.random.normal(km, (NOUT,), jnp.float32),
        "var": jax.random.uniform(kv, (NOUT,), jnp.float32, 0.5, 1.5),
    }

    out = std_upsample(x, params, kern=KERN, stri=STRI)
    out = jax.block_until_ready(out)
    assert out.shape == (N, NOUT, H * KERN, W * KERN)

    ref = _reference(x, params, kern=KERN, stri=STRI)
    np.testing.assert_allclose(np.asarray(out), np.asarray(ref), rtol=2e-3, atol=2e-3)

    print("KERNEL_OK")
</pallas_src>

<mosaic_0001>
module attributes {stable_mosaic.version = 11 : i64} {
  func.func @_std_upsample_kernel(%arg0: i32, %arg1: memref<256x4xbf16, #tpu.memory_space<vmem>>, %arg2: memref<4x128xbf16, #tpu.memory_space<vmem>>, %arg3: memref<1x128xf32, #tpu.memory_space<vmem>>, %arg4: memref<1x128xf32, #tpu.memory_space<vmem>>, %arg5: memref<1x128xf32, #tpu.memory_space<vmem>>, %arg6: memref<256x128xf32, #tpu.memory_space<vmem>>) attributes {dimension_semantics = [#tpu.dimension_semantics<parallel>], iteration_bounds = array<i64: 2>, scalar_prefetch = 0 : i64, scratch_operands = 0 : i64, tpu.core_type = #tpu.core_type<tc>, window_params = [{transform_indices = @transform_0, window_bounds = array<i64: 256, 4>}, {pipeline_mode = #tpu.pipeline_mode<synchronous>, transform_indices = @transform_1, window_bounds = array<i64: 4, 128>}, {pipeline_mode = #tpu.pipeline_mode<synchronous>, transform_indices = @transform_2, window_bounds = array<i64: 1, 128>}, {pipeline_mode = #tpu.pipeline_mode<synchronous>, transform_indices = @transform_3, window_bounds = array<i64: 1, 128>}, {pipeline_mode = #tpu.pipeline_mode<synchronous>, transform_indices = @transform_4, window_bounds = array<i64: 1, 128>}, {transform_indices = @transform_5, window_bounds = array<i64: 256, 128>}]} {
    %c0 = arith.constant 0 : index
    %c0_0 = arith.constant 0 : index
    %0 = vector.load %arg1[%c0, %c0_0] : memref<256x4xbf16, #tpu.memory_space<vmem>>, vector<256x4xbf16>
    %c0_1 = arith.constant 0 : index
    %c0_2 = arith.constant 0 : index
    %1 = vector.load %arg2[%c0_1, %c0_2] : memref<4x128xbf16, #tpu.memory_space<vmem>>, vector<4x128xbf16>
    %cst = arith.constant dense<0.000000e+00> : vector<256x128xf32>
    %2 = tpu.matmul %0, %1, %cst {dimension_numbers = #tpu.dot_dimension_numbers<[1], [0], [0], [1], [0, 0, 1, 1], [], []>} : vector<256x4xbf16>, vector<4x128xbf16>, vector<256x128xf32> -> vector<256x128xf32>
    %c0_3 = arith.constant 0 : index
    %c0_4 = arith.constant 0 : index
    %3 = vector.load %arg3[%c0_3, %c0_4] : memref<1x128xf32, #tpu.memory_space<vmem>>, vector<1x128xf32>
    %4 = vector.broadcast %3 : vector<1x128xf32> to vector<256x128xf32>
    %5 = arith.addf %2, %4 : vector<256x128xf32>
    %cst_5 = arith.constant 0.000000e+00 : f32
    %6 = vector.broadcast %cst_5 : f32 to vector<256x128xf32>
    %7 = arith.maximumf %5, %6 : vector<256x128xf32>
    %c0_6 = arith.constant 0 : index
    %c0_7 = arith.constant 0 : index
    %8 = vector.load %arg4[%c0_6, %c0_7] : memref<1x128xf32, #tpu.memory_space<vmem>>, vector<1x128xf32>
    %9 = vector.broadcast %8 : vector<1x128xf32> to vector<256x128xf32>
    %10 = arith.mulf %7, %9 : vector<256x128xf32>
    %c0_8 = arith.constant 0 : index
    %c0_9 = arith.constant 0 : index
    %11 = vector.load %arg5[%c0_8, %c0_9] : memref<1x128xf32, #tpu.memory_space<vmem>>, vector<1x128xf32>
    %12 = vector.broadcast %11 : vector<1x128xf32> to vector<256x128xf32>
    %13 = arith.addf %10, %12 : vector<256x128xf32>
    %c0_10 = arith.constant 0 : index
    %c0_11 = arith.constant 0 : index
    %14 = vector.load %arg6[%c0_10, %c0_11] : memref<256x128xf32, #tpu.memory_space<vmem>>, vector<256x128xf32>
    tpu.vector_store %arg6[%c0_10, %c0_11], %13 {strides = array<i32>} : memref<256x128xf32, #tpu.memory_space<vmem>>, vector<256x128xf32>,
    return
  }
  func.func @transform_0(%arg0: i32) -> (i32, i32) {
    %c0_i32 = arith.constant 0 : i32
    %c0_i32_0 = arith.constant 0 : i32
    return %arg0, %c0_i32 : i32, i32
  }
  func.func @transform_1(%arg0: i32) -> (i32, i32) {
    %c0_i32 = arith.constant 0 : i32
    %c0_i32_0 = arith.constant 0 : i32
    %c0_i32_1 = arith.constant 0 : i32
    return %c0_i32, %c0_i32_0 : i32, i32
  }
  func.func @transform_2(%arg0: i32) -> (i32, i32) {
    %c0_i32 = arith.constant 0 : i32
    %c0_i32_0 = arith.constant 0 : i32
    %c0_i32_1 = arith.constant 0 : i32
    return %c0_i32, %c0_i32_0 : i32, i32
  }
  func.func @transform_3(%arg0: i32) -> (i32, i32) {
    %c0_i32 = arith.constant 0 : i32
    %c0_i32_0 = arith.constant 0 : i32
    %c0_i32_1 = arith.constant 0 : i32
    return %c0_i32, %c0_i32_0 : i32, i32
  }
  func.func @transform_4(%arg0: i32) -> (i32, i32) {
    %c0_i32 = arith.constant 0 : i32
    %c0_i32_0 = arith.constant 0 : i32
    %c0_i32_1 = arith.constant 0 : i32
    return %c0_i32, %c0_i32_0 : i32, i32
  }
  func.func @transform_5(%arg0: i32) -> (i32, i32) {
    %c0_i32 = arith.constant 0 : i32
    %c0_i32_0 = arith.constant 0 : i32
    return %arg0, %c0_i32 : i32, i32
  }
}

</mosaic_0001>

<bundles_post_ra>
// kernel: tpu_custom_call.1
= control target key start
LH: loop header
LB: loop body
LE: loop exit
PB: predicated region body
PF: predicated region fallthrough
CT: control target
= control target key end

     0   :  { %10 = vsyncpa [#allocation3], 0  ;;  %s1322_s0 = inlined_call_operand.vmem [shape: bf16[512,4], index: 0, kind: input, shape index: {}]   ;;  %s1323_s1 = inlined_call_operand.vmem [shape: bf16[4,128], index: 1, kind: input, shape index: {}]   ;;  %s1324_s2 = inlined_call_operand.vmem [shape: f32[1,128], index: 2, kind: input, shape index: {}]   ;;  %s1325_s3 = inlined_call_operand.vmem [shape: f32[1,128], index: 3, kind: input, shape index: {}]   ;;  %s1326_s4 = inlined_call_operand.vmem [shape: f32[1,128], index: 4, kind: input, shape index: {}]   ;;  %s1327_s5 = inlined_call_operand.hbm [shape: f32[512,128], index: 5, kind: output, shape index: {}]  }
   0x1   :  { %12 = vsyncpa [#allocation3 + $0x1], 0  ;;  %s1034_s18 = smov 0   ;;  %s1036_s19 = smov 0  }
   0x2   :  { %s1038_s20 = smov 0   ;;  %s1040_s21 = smov 0  }
   0x3 LB: > { %s1055_s22 = sadd.s32 4294967295, %s999_s21   ;;  %s779_s23 = sadd.s32 4294967294, %s999_s21   ;;  %s999_s21 = sphi %s1040_s21, %s1333_s21   ;;  %s995_s20 = sphi %s1038_s20, %s1332_s20   ;;  %s991_s19 = sphi %s1036_s19, %s1331_s19   ;;  %s987_s18 = sphi %s1034_s18, %s1330_s18  }
   0x4   : > { %s1059_s24 = sadd.s32 1, %s999_s21   ;;  %s135_s25 = sadd.s32 1, %s995_s20 }
   0x5   : > { %s132_s26 = ssub.s32 %s999_s21, %s1059_s24  ;;  %p145_p0 = scmp.ne.s32.totalorder %s995_s20, %s991_s19 }
   0x6   : > { %p133_p1 = scmp.eq.s32.totalorder %s132_s26, 0  ;;  %p146_p2 = scmp.eq.s32.totalorder %s1055_s22, 1 }
   0x7   : > { %p151_p3 = scmp.ne.s32.totalorder %s991_s19, %s987_s18  ;;  %p152_p4 = scmp.eq.s32.totalorder %s779_s23, 1 }
   0x8   : > { %s1070_s27 = scalar_select %p133_p1, %s995_s20, %s135_s25  }
   0x9   : > { %p1072_p5 = por %p146_p2, %p145_p0  ;;  %p1076_p6 = por %p152_p4, %p151_p3 }
   0xa   : > { %p782_p7 = scmp.ge.s32.totalorder %s999_s21, 1  ;;  %p191_p8 = scmp.lt.s32.totalorder %s999_s21, 3 }
   0xc   : > { %p192_p9 = pnand %p782_p7, %p191_p8 }
   0xd   : > { %s784_s7 = sshll.u32 (!%p192_p9), %s1055_s22, 5  ;;  %s216_s14 = sand.u32 (!%p192_p9), 1, %s991_s19  }
   0xe   : > { %195 = sbr.rel (%p192_p9) target bundleno = 270 (0x10e), region = 40  ;;  %p220_p10 = scmp.lt.s32.totalorder (!%p192_p9), %s784_s7, 63 }
   0xf   : > { %s783_s17 = sshll.u32 (!%p192_p9), %s216_s14, 8  ;;  %s826_s30 = sshll.u32 (!%p192_p9), %s1055_s22, 12 }
  0x10   : > { %s1155_s26 = scalar_lea.vmem (!%p192_p9), [#allocation2], %s783_s17  ;;  %s1272_s22 = scalar_lea.hbm (!%p192_p9), %s1327_s5, %s826_s30 }
  0x11   : > { %s717_s6 = sshll.u32 (!%p192_p9), %s1155_s26, 4  ;;  %s1282_s9 = scalar_lea.sflag (!%p192_p9), [#allocation3], %s216_s14  ;;  %s1274_s6 = int_to_ptr.vmem [resolvable:$true] %s717_s6 }
  0x12   : > { %s939_s10 = scalar_lea.vmem (!%p192_p9), %s1274_s6, 4096 }
  0x13   : > { %v259_v0 = vld [vmem:[%s1323_s1] sm:$0x3]  ;;  %vm396_vm0 = vcmask 1041408   ;;  %s1335_s7 = smov (!%p220_p10, %s784_s7), 63  ;;  %vm347_vm1 = vcmask 31744   ;;  %p940_p11 = scmp.ne.s32.totalorder %s1274_s6, %s939_s10 }
  0x14   : > { %880 = vmatprep.subr.msk.bf16.mxu0 %vm396_vm0, %v259_v0  ;;  %881 = vmatprep.subr.msk.bf16.mxu1 %vm396_vm0, %v259_v0  ;;  %v398_v1 = vsel %vm396_vm0, %v259_v0, 0  ;;  %s785_s8 = sshll.u32 %s1335_s7, 2  ;;  %v1126_v18 = vld [vmem:[%s1324_s2] ss:$0 sm:$0xff] }
  0x15   : > { %845 = vmatpush3.bf16.msra.mxu0 %v398_v1  ;;  %879 = vmatpush3.bf16.msra.mxu1 %v398_v1  ;;  %s1089_s11 = scalar_lea.vmem %s1322_s0, %s785_s8  ;;  %v1133_v22 = vld [vmem:[%s1325_s3] ss:$0 sm:$0xff]  ;;  %p941_p12 = pnand %p940_p11, %p1072_p5 }
  0x16   : > { %v923_v2 = vld [vmem:[%s1089_s11] sm:$0xff]   ;;  %v925_v4 = vld [vmem:[%s1089_s11 + $0x8] sm:$0xff]   ;;  %v927_v6 = vld [vmem:[%s1089_s11 + $0x10] sm:$0xff]  }
  0x17   : > { %v924_v3 = vld [vmem:[%s1089_s11 + $0x40] sm:$0xff]   ;;  %846 = vmatprep.mubr.msk.bf16.mxu0 %vm347_vm1, %v923_v2  ;;  %v926_v5 = vld [vmem:[%s1089_s11 + $0x48] sm:$0xff]   ;;  %v928_v7 = vld [vmem:[%s1089_s11 + $0x50] sm:$0xff]   ;;  %p942_p13 = pneg %p941_p12 }
  0x18   : > { %862 = vmatprep.mubr.msk.bf16.mxu1 %vm347_vm1, %v924_v3  ;;  %847 = vmatmul.mubr.msk.bf16.vlgmr.msra.gmra.mxu0 %vm347_vm1, %v925_v4  ;;  %v929_v8 = vld [vmem:[%s1089_s11 + $0x18] sm:$0xff]   ;;  %v931_v10 = vld [vmem:[%s1089_s11 + $0x20] sm:$0xff]   ;;  %v933_v12 = vld [vmem:[%s1089_s11 + $0x28] sm:$0xff]  }
  0x19   : > { %863 = vmatmul.mubr.msk.bf16.vlgmr.msra.gmra.mxu1 %vm347_vm1, %v926_v5  ;;  %850 = vmatprep.mubr.msk.bf16.mxu0 %vm347_vm1, %v927_v6  ;;  %v930_v9 = vld [vmem:[%s1089_s11 + $0x58] sm:$0xff]   ;;  %v932_v11 = vld [vmem:[%s1089_s11 + $0x60] sm:$0xff]   ;;  %v934_v13 = vld [vmem:[%s1089_s11 + $0x68] sm:$0xff]  }
  0x1a   : > { %866 = vmatprep.mubr.msk.bf16.mxu1 %vm347_vm1, %v928_v7  ;;  %v935_v14 = vld [vmem:[%s1089_s11 + $0x30] sm:$0xff]   ;;  %v937_v16 = vld [vmem:[%s1089_s11 + $0x38] sm:$0xff]   ;;  %v1142_v28 = vld [vmem:[%s1326_s4] ss:$0 sm:$0xff] }
  0x1b   : > { %v936_v15 = vld [vmem:[%s1089_s11 + $0x70] sm:$0xff]   ;;  %v938_v17 = vld [vmem:[%s1089_s11 + $0x78] sm:$0xff]   ;;  %s1001_s11 = smov [#allocation2]  }
  0x1c   : > { %s943_s12 = sshll.u32 %s1001_s11, 4  ;;  %s944_s12 = int_to_ptr.vmem [resolvable:$false] %s943_s12 }
  0x1d   : > { %s945_s13 = scalar_lea.vmem %s944_s12, 8192  ;;  %p946_p0 = scmp.lt.s32.totalorder %s1274_s6, %s944_s12 }
  0x1e   : > { %p947_p1 = scmp.lt.s32.totalorder %s945_s13, %s939_s10 }
  0x20   : > { %851 = vmatmul.mubr.msk.bf16.gmra.mxu0 %vm347_vm1, %v929_v8  ;;  %p948_p2 = por %p947_p1, %p946_p0 }
  0x21   : > { %867 = vmatmul.mubr.msk.bf16.gmra.mxu1 %vm347_vm1, %v930_v9  ;;  %854 = vmatprep.mubr.msk.bf16.mxu0 %vm347_vm1, %v931_v10 }
  0x22   : > { %870 = vmatprep.mubr.msk.bf16.mxu1 %vm347_vm1, %v932_v11  ;;  %p949_p3 = pnand %p948_p2, %p942_p13 }
  0x28   : > { %855 = vmatmul.mubr.msk.bf16.gmra.mxu0 %vm347_vm1, %v933_v12 }
  0x29   : > { %871 = vmatmul.mubr.msk.bf16.gmra.mxu1 %vm347_vm1, %v934_v13  ;;  %858 = vmatprep.mubr.msk.bf16.mxu0 %vm347_vm1, %v935_v14 }
  0x2a   : > { %874 = vmatprep.mubr.msk.bf16.mxu1 %vm347_vm1, %v936_v15 }
  0x30   : > { %859 = vmatmul.mubr.msk.bf16.gmra.mxu0 %vm347_vm1, %v937_v16 }
  0x31   : > { %875 = vmatmul.mubr.msk.bf16.gmra.mxu1 %vm347_vm1, %v938_v17 }
  0xd8   : > { %v848_v19 = vpop.f32.mrf.mxu0 }
  0xd9   : > { %v443_v20 = vadd.f32 %v848_v19, %v1126_v18  ;;  %v864_v21 = vpop.f32.mrf.mxu1 }
  0xda   : > { %v507_v23 = vadd.f32 %v864_v21, %v1126_v18  ;;  %v434_v24 = vpop.f32.mrf.mxu0 }
  0xdb   : > { %v563_v25 = vmax.f32 %v443_v20, 0.0  ;;  %v435_v26 = vadd.f32 %v1126_v18, %v434_v24  ;;  %v498_v27 = vpop.f32.mrf.mxu1 }
  0xdc   : > { %v579_v29 = vmax.f32 %v507_v23, 0.0  ;;  %v499_v30 = vadd.f32 %v1126_v18, %v498_v27  ;;  %v849_v31 = vpop.f32.mrf.mxu0 }
  0xdd   : > { %v602_v32 = vmul.f32 %v1133_v22, %v563_v25  ;;  %v561_v33 = vmax.f32 %v435_v26, 0.0  ;;  %v446_v34 = vadd.f32 %v849_v31, %v1126_v18  ;;  %v865_v35 = vpop.f32.mrf.mxu1 }
  0xde   : > { %v618_v36 = vmul.f32 %v1133_v22, %v579_v29  ;;  %v577_v37 = vmax.f32 %v499_v30, 0.0  ;;  %v510_v38 = vadd.f32 %v865_v35, %v1126_v18  ;;  %v437_v39 = vpop.f32.mrf.mxu0 }
  0xdf   : > { %v641_v40 = vadd.f32 %v1142_v28, %v602_v32  ;;  %v600_v41 = vmul.f32 %v1133_v22, %v561_v33  ;;  %v564_v42 = vmax.f32 %v446_v34, 0.0  ;;  %v438_v43 = vadd.f32 %v1126_v18, %v437_v39  ;;  %v501_v44 = vpop.f32.mrf.mxu1 }
  0xe0   : > { %v657_v45 = vadd.f32 %v1142_v28, %v618_v36  ;;  %v616_v46 = vmul.f32 %v1133_v22, %v577_v37  ;;  %v580_v47 = vmax.f32 %v510_v38, 0.0  ;;  %v502_v48 = vadd.f32 %v1126_v18, %v501_v44  ;;  %v852_v49 = vpop.f32.mrf.mxu0 }
  0xe1   : > { %673 = vst [vmem:[%s1155_s26 + $0x10] sm:$0xff] %v641_v40  ;;  %v639_v50 = vadd.f32 %v1142_v28, %v600_v41  ;;  %v603_v51 = vmul.f32 %v1133_v22, %v564_v42  ;;  %v562_v52 = vmax.f32 %v438_v43, 0.0  ;;  %v459_v53 = vadd.f32 %v852_v49, %v1126_v18  ;;  %v868_v54 = vpop.f32.mrf.mxu1 }
  0xe2   : > { %689 = vst [vmem:[%s1155_s26 + $0x90] sm:$0xff] %v657_v45  ;;  %v655_v55 = vadd.f32 %v1142_v28, %v616_v46  ;;  %v619_v56 = vmul.f32 %v1133_v22, %v580_v47  ;;  %v578_v57 = vmax.f32 %v502_v48, 0.0  ;;  %v523_v58 = vadd.f32 %v868_v54, %v1126_v18  ;;  %v450_v59 = vpop.f32.mrf.mxu0 }
  0xe3   : > { %671 = vst [vmem:[%s1155_s26] sm:$0xff] %v639_v50  ;;  %v642_v60 = vadd.f32 %v1142_v28, %v603_v51  ;;  %v601_v61 = vmul.f32 %v1133_v22, %v562_v52  ;;  %v567_v62 = vmax.f32 %v459_v53, 0.0  ;;  %v451_v63 = vadd.f32 %v1126_v18, %v450_v59  ;;  %v514_v0 = vpop.f32.mrf.mxu1 }
  0xe4   : > { %687 = vst [vmem:[%s1155_s26 + $0x80] sm:$0xff] %v655_v55  ;;  %v658_v1 = vadd.f32 %v1142_v28, %v619_v56  ;;  %v617_v2 = vmul.f32 %v1133_v22, %v578_v57  ;;  %v583_v3 = vmax.f32 %v523_v58, 0.0  ;;  %v515_v4 = vadd.f32 %v1126_v18, %v514_v0  ;;  %v853_v5 = vpop.f32.mrf.mxu0 }
  0xe5   : > { %674 = vst [vmem:[%s1155_s26 + $0x18] sm:$0xff] %v642_v60  ;;  %v640_v6 = vadd.f32 %v1142_v28, %v601_v61  ;;  %v606_v7 = vmul.f32 %v1133_v22, %v567_v62  ;;  %v565_v8 = vmax.f32 %v451_v63, 0.0  ;;  %v462_v9 = vadd.f32 %v853_v5, %v1126_v18  ;;  %v869_v10 = vpop.f32.mrf.mxu1 }
  0xe6   : > { %690 = vst [vmem:[%s1155_s26 + $0x98] sm:$0xff] %v658_v1  ;;  %v656_v11 = vadd.f32 %v1142_v28, %v617_v2  ;;  %v622_v12 = vmul.f32 %v1133_v22, %v583_v3  ;;  %v581_v13 = vmax.f32 %v515_v4, 0.0  ;;  %v526_v14 = vadd.f32 %v869_v10, %v1126_v18  ;;  %v453_v15 = vpop.f32.mrf.mxu0 }
  0xe7   : > { %672 = vst [vmem:[%s1155_s26 + $0x8] sm:$0xff] %v640_v6  ;;  %v645_v16 = vadd.f32 %v1142_v28, %v606_v7  ;;  %v604_v17 = vmul.f32 %v1133_v22, %v565_v8  ;;  %v568_v19 = vmax.f32 %v462_v9, 0.0  ;;  %v454_v20 = vadd.f32 %v1126_v18, %v453_v15  ;;  %v517_v21 = vpop.f32.mrf.mxu1 }
  0xe8   : > { %688 = vst [vmem:[%s1155_s26 + $0x88] sm:$0xff] %v656_v11  ;;  %v661_v23 = vadd.f32 %v1142_v28, %v622_v12  ;;  %v620_v24 = vmul.f32 %v1133_v22, %v581_v13  ;;  %v584_v25 = vmax.f32 %v526_v14, 0.0  ;;  %v518_v26 = vadd.f32 %v1126_v18, %v517_v21  ;;  %v856_v27 = vpop.f32.mrf.mxu0 }
  0xe9   : > { %677 = vst [vmem:[%s1155_s26 + $0x30] sm:$0xff] %v645_v16  ;;  %v643_v29 = vadd.f32 %v1142_v28, %v604_v17  ;;  %v607_v30 = vmul.f32 %v1133_v22, %v568_v19  ;;  %v566_v31 = vmax.f32 %v454_v20, 0.0  ;;  %v475_v32 = vadd.f32 %v856_v27, %v1126_v18  ;;  %v872_v33 = vpop.f32.mrf.mxu1 }
  0xea   : > { %693 = vst [vmem:[%s1155_s26 + $0xb0] sm:$0xff] %v661_v23  ;;  %v659_v34 = vadd.f32 %v1142_v28, %v620_v24  ;;  %v623_v35 = vmul.f32 %v1133_v22, %v584_v25  ;;  %v582_v36 = vmax.f32 %v518_v26, 0.0  ;;  %v539_v37 = vadd.f32 %v872_v33, %v1126_v18  ;;  %v466_v38 = vpop.f32.mrf.mxu0 }
  0xeb   : > { %675 = vst [vmem:[%s1155_s26 + $0x20] sm:$0xff] %v643_v29  ;;  %v646_v39 = vadd.f32 %v1142_v28, %v607_v30  ;;  %v605_v40 = vmul.f32 %v1133_v22, %v566_v31  ;;  %v571_v41 = vmax.f32 %v475_v32, 0.0  ;;  %v467_v42 = vadd.f32 %v1126_v18, %v466_v38  ;;  %v530_v43 = vpop.f32.mrf.mxu1 }
  0xec   : > { %691 = vst [vmem:[%s1155_s26 + $0xa0] sm:$0xff] %v659_v34  ;;  %v662_v44 = vadd.f32 %v1142_v28, %v623_v35  ;;  %v621_v45 = vmul.f32 %v1133_v22, %v582_v36  ;;  %v587_v46 = vmax.f32 %v539_v37, 0.0  ;;  %v531_v47 = vadd.f32 %v1126_v18, %v530_v43  ;;  %v857_v48 = vpop.f32.mrf.mxu0 }
  0xed   : > { %678 = vst [vmem:[%s1155_s26 + $0x38] sm:$0xff] %v646_v39  ;;  %v644_v49 = vadd.f32 %v1142_v28, %v605_v40  ;;  %v610_v50 = vmul.f32 %v1133_v22, %v571_v41  ;;  %v569_v51 = vmax.f32 %v467_v42, 0.0  ;;  %v478_v52 = vadd.f32 %v857_v48, %v1126_v18  ;;  %v873_v53 = vpop.f32.mrf.mxu1 }
  0xee   : > { %694 = vst [vmem:[%s1155_s26 + $0xb8] sm:$0xff] %v662_v44  ;;  %v660_v54 = vadd.f32 %v1142_v28, %v621_v45  ;;  %v626_v55 = vmul.f32 %v1133_v22, %v587_v46  ;;  %v585_v56 = vmax.f32 %v531_v47, 0.0  ;;  %v542_v57 = vadd.f32 %v873_v53, %v1126_v18  ;;  %v469_v58 = vpop.f32.mrf.mxu0 }
  0xef   : > { %676 = vst [vmem:[%s1155_s26 + $0x28] sm:$0xff] %v644_v49  ;;  %v649_v59 = vadd.f32 %v1142_v28, %v610_v50  ;;  %v608_v60 = vmul.f32 %v1133_v22, %v569_v51  ;;  %v572_v61 = vmax.f32 %v478_v52, 0.0  ;;  %v470_v62 = vadd.f32 %v1126_v18, %v469_v58  ;;  %v533_v63 = vpop.f32.mrf.mxu1 }
  0xf0   : > { %692 = vst [vmem:[%s1155_s26 + $0xa8] sm:$0xff] %v660_v54  ;;  %v665_v0 = vadd.f32 %v1142_v28, %v626_v55  ;;  %v624_v1 = vmul.f32 %v1133_v22, %v585_v56  ;;  %v588_v2 = vmax.f32 %v542_v57, 0.0  ;;  %v534_v3 = vadd.f32 %v1126_v18, %v533_v63  ;;  %v860_v4 = vpop.f32.mrf.mxu0 }
  0xf1   : > { %681 = vst [vmem:[%s1155_s26 + $0x50] sm:$0xff] %v649_v59  ;;  %v647_v5 = vadd.f32 %v1142_v28, %v608_v60  ;;  %v611_v6 = vmul.f32 %v1133_v22, %v572_v61  ;;  %v570_v7 = vmax.f32 %v470_v62, 0.0  ;;  %v491_v8 = vadd.f32 %v860_v4, %v1126_v18  ;;  %v876_v9 = vpop.f32.mrf.mxu1 }
  0xf2   : > { %697 = vst [vmem:[%s1155_s26 + $0xd0] sm:$0xff] %v665_v0  ;;  %v663_v10 = vadd.f32 %v1142_v28, %v624_v1  ;;  %v627_v11 = vmul.f32 %v1133_v22, %v588_v2  ;;  %v586_v12 = vmax.f32 %v534_v3, 0.0  ;;  %v555_v13 = vadd.f32 %v876_v9, %v1126_v18  ;;  %v482_v14 = vpop.f32.mrf.mxu0 }
  0xf3   : > { %679 = vst [vmem:[%s1155_s26 + $0x40] sm:$0xff] %v647_v5  ;;  %v650_v15 = vadd.f32 %v1142_v28, %v611_v6  ;;  %v609_v16 = vmul.f32 %v1133_v22, %v570_v7  ;;  %v575_v17 = vmax.f32 %v491_v8, 0.0  ;;  %v483_v19 = vadd.f32 %v1126_v18, %v482_v14  ;;  %v546_v20 = vpop.f32.mrf.mxu1 }
  0xf4   : > { %695 = vst [vmem:[%s1155_s26 + $0xc0] sm:$0xff] %v663_v10  ;;  %v666_v21 = vadd.f32 %v1142_v28, %v627_v11  ;;  %v625_v23 = vmul.f32 %v1133_v22, %v586_v12  ;;  %v591_v24 = vmax.f32 %v555_v13, 0.0  ;;  %v547_v25 = vadd.f32 %v1126_v18, %v546_v20  ;;  %v861_v26 = vpop.f32.mrf.mxu0 }
  0xf5   : > { %682 = vst [vmem:[%s1155_s26 + $0x58] sm:$0xff] %v650_v15  ;;  %v648_v27 = vadd.f32 %v1142_v28, %v609_v16  ;;  %v614_v29 = vmul.f32 %v1133_v22, %v575_v17  ;;  %v573_v30 = vmax.f32 %v483_v19, 0.0  ;;  %v494_v31 = vadd.f32 %v861_v26, %v1126_v18  ;;  %v877_v32 = vpop.f32.mrf.mxu1 }
  0xf6   : > { %698 = vst [vmem:[%s1155_s26 + $0xd8] sm:$0xff] %v666_v21  ;;  %v664_v33 = vadd.f32 %v1142_v28, %v625_v23  ;;  %v630_v34 = vmul.f32 %v1133_v22, %v591_v24  ;;  %v589_v35 = vmax.f32 %v547_v25, 0.0  ;;  %v558_v36 = vadd.f32 %v877_v32, %v1126_v18  ;;  %v485_v37 = vpop.f32.mrf.mxu0 }
  0xf7   : > { %680 = vst [vmem:[%s1155_s26 + $0x48] sm:$0xff] %v648_v27  ;;  %v653_v38 = vadd.f32 %v1142_v28, %v614_v29  ;;  %v612_v39 = vmul.f32 %v1133_v22, %v573_v30  ;;  %v576_v40 = vmax.f32 %v494_v31, 0.0  ;;  %v486_v41 = vadd.f32 %v1126_v18, %v485_v37  ;;  %v549_v42 = vpop.f32.mrf.mxu1 }
  0xf8   : > { %696 = vst [vmem:[%s1155_s26 + $0xc8] sm:$0xff] %v664_v33  ;;  %v669_v43 = vadd.f32 %v1142_v28, %v630_v34  ;;  %v628_v44 = vmul.f32 %v1133_v22, %v589_v35  ;;  %v592_v45 = vmax.f32 %v558_v36, 0.0  ;;  %v550_v46 = vadd.f32 %v1126_v18, %v549_v42 }
  0xf9   : > { %685 = vst [vmem:[%s1155_s26 + $0x70] sm:$0xff] %v653_v38  ;;  %v651_v47 = vadd.f32 %v1142_v28, %v612_v39  ;;  %v615_v48 = vmul.f32 %v1133_v22, %v576_v40  ;;  %v574_v49 = vmax.f32 %v486_v41, 0.0 }
  0xfa   : > { %701 = vst [vmem:[%s1155_s26 + $0xf0] sm:$0xff] %v669_v43  ;;  %v667_v50 = vadd.f32 %v1142_v28, %v628_v44  ;;  %v631_v51 = vmul.f32 %v1133_v22, %v592_v45  ;;  %v590_v52 = vmax.f32 %v550_v46, 0.0 }
  0xfb   : > { %683 = vst [vmem:[%s1155_s26 + $0x60] sm:$0xff] %v651_v47  ;;  %v654_v18 = vadd.f32 %v1142_v28, %v615_v48  ;;  %v613_v53 = vmul.f32 %v1133_v22, %v574_v49 }
  0xfc   : > { %699 = vst [vmem:[%s1155_s26 + $0xe0] sm:$0xff] %v667_v50  ;;  %v670_v54 = vadd.f32 %v1142_v28, %v631_v51  ;;  %v629_v55 = vmul.f32 %v1133_v22, %v590_v52 }
  0xfd   : > { %686 = vst [vmem:[%s1155_s26 + $0x78] sm:$0xff] %v654_v18  ;;  %v652_v56 = vadd.f32 %v1142_v28, %v613_v53 }
  0xfe   : > { %702 = vst [vmem:[%s1155_s26 + $0xf8] sm:$0xff] %v670_v54  ;;  %v668_v57 = vadd.f32 %v1142_v28, %v629_v55 }
  0xff   : > { %684 = vst [vmem:[%s1155_s26 + $0x68] sm:$0xff] %v652_v56 }
 0x100   : > { %700 = vst [vmem:[%s1155_s26 + $0xe8] sm:$0xff] %v668_v57 }
 0x101   : > { %952 = shalt.err (!%p949_p3)
}
 0x102   : > { %s953_s14 = scalar_lea.hbm %s1272_s22, 4096  ;;  %s957_s17 = scalar_lea.hbm %s1327_s5, 8192 }
 0x103   : > { %p954_p4 = scmp.ne.s32.totalorder %s1272_s22, %s953_s14  ;;  %p958_p9 = scmp.lt.s32.totalorder %s1272_s22, %s1327_s5 }
 0x104   : > { %p959_p10 = scmp.lt.s32.totalorder %s957_s17, %s953_s14 }
 0x105   : > { %p955_p7 = pnand %p954_p4, %p1072_p5 }
 0x106   : > { %p960_p11 = por %p959_p10, %p958_p9 }
 0x107   : > { %p956_p8 = pneg %p955_p7 }
 0x109   : > { %p961_p12 = pnand %p960_p11, %p956_p8 }
 0x10b   : > { %964 = shalt.err (!%p961_p12)
}
 0x10c   : > { %s1002_s26 = smov 128   ;;  %s1003_s30 = smov 8  }
 0x10d   : > { %882 = dma.vmem_to_hbm [thread:$0]  (%p1072_p5), %s1274_s6, 4096, %s1272_s22, %s1282_s9, %s1002_s26, %s1002_s26, %s1003_s30  }
 0x10e PF: > { %p888_p13 = scmp.ge.s32.totalorder %s999_s21, 2  ;;  %s732_s7 = sand.u32 1, %s987_s18  }
 0x10f   : > { %s733_s8 = scalar_lea.sflag [#allocation3], %s732_s7 }
 0x110   : > { %p885_p0 = pnand %p888_p13, %p1076_p6 }
 0x112   : > { %p886_p1 = pneg %p885_p0 }
 0x114   : > { %982 = dma.done.wait (%p886_p1), %s733_s8, 4096  }
 0x115   : > { %984 = vsyncadd (%p886_p1), %s733_s8, 4294963200  ;;  %p15_p2 = scmp.ge.s32.totalorder %s1059_s24, 4   ;;  %s1330_s18 = smov %s991_s19 }
 0x116   : > { %s1331_s19 = smov %s995_s20  ;;  %s1332_s20 = smov %s1070_s27 }
 0x117   : > { %s1333_s21 = smov %s1059_s24  ;;  %17 = sbr.rel (!%p15_p2) target bundleno = 3 (0x3), region = 75 }
 0x11c   :  { %738 = vsyncpa [#allocation3], 1 }
 0x11d   :  { %740 = vsyncpa [#allocation3 + $0x1], 1 }

</bundles_post_ra>
